<compile_context>
chip_gen: v7x
topology: tpu7x:2x2x1
jax: 0.10.0
libtpu: 0.0.40
codegen_flags: <defaults>
</compile_context>

<pallas_src>
import math
from functools import partial

import jax
import jax.numpy as jnp
from jax import lax
from jax.experimental import pallas as pl
from jax.experimental.pallas import tpu as pltpu


def _round_up(v, m):
    return (v + m - 1) // m * m


def _sublane_multiple(dtype):
    # Second-to-last block dim must be a multiple of 8 (f32) / 16 (bf16) /
    # 32 (int8, fp8) because sub-32-bit dtypes pack along sublanes.
    return max(8, 32 // jnp.dtype(dtype).itemsize)


# Tile candidates (all multiples of 128; 512/256 keep full 256-wide MXU tiles
# on v6e/v7x, 384/128 exist to kill ragged-N/K padding waste).
_M_TILES = (512, 384, 256, 128)
_N_TILES = (512, 384, 256, 128)
_K_TILES = (1024, 768, 512, 384, 256, 128)


def _pick_tile(dim, candidates, align):
    """Pick a tile size for a dimension of size `dim`.

    Dims that fit inside the largest candidate get a single exact
    (align-rounded) block, i.e. zero padding waste.  Larger dims pick the
    biggest candidate that minimizes padding waste.
    """
    dim_a = _round_up(max(dim, 1), align)
    if dim_a <= max(candidates):
        return dim_a
    best_t, best_waste = None, None
    for t in sorted(candidates, reverse=True):
        waste = _round_up(dim_a, t) - dim_a
        if best_waste is None or waste < best_waste:
            best_t, best_waste = t, waste
    return best_t


def _vmem_limit_bytes():
    """Scoped-VMEM budget gated on physical VMEM: ~3/4 of capacity, capped at
    96 MiB (v5e/v6e: 128 MiB physical -> 96 MiB; v7x: 64 MiB -> 48 MiB)."""
    try:
        cap = int(pltpu.get_tpu_info().vmem_capacity_bytes)
    except Exception:
        cap = 64 << 20  # conservative fallback: assume the smallest (v7x)
    return min((cap * 3) // 4, 96 << 20)


def _make_kernel(has_bias, direct_acc):
    """Build the matmul kernel.

    direct_acc=True (f32 output): accumulate straight into the resident
    output block (its index_map ignores k) -> no VMEM scratch, no final copy.
    direct_acc=False: classic f32 scratch accumulator + cast on last K step.
    """
    if direct_acc:
        def kernel(*refs):
            if has_bias:
                x_ref, w_ref, b_ref, o_ref = refs
            else:
                x_ref, w_ref, o_ref = refs

            @pl.when(pl.program_id(2) == 0)
            def _():
                if has_bias:
                    o_ref[...] = jnp.broadcast_to(
                        b_ref[...].astype(o_ref.dtype), o_ref.shape)
                else:
                    o_ref[...] = jnp.zeros_like(o_ref)

            o_ref[...] += jnp.dot(x_ref[...], w_ref[...],
                                  preferred_element_type=jnp.float32)

        return kernel

    def kernel(*refs):
        if has_bias:
            x_ref, w_ref, b_ref, o_ref, acc_ref = refs
        else:
            x_ref, w_ref, o_ref, acc_ref = refs
        k = pl.program_id(2)

        @pl.when(k == 0)
        def _():
            acc_ref[...] = jnp.zeros_like(acc_ref)

        acc_ref[...] += jnp.dot(x_ref[...], w_ref[...],
                                preferred_element_type=jnp.float32)

        @pl.when(k == pl.num_programs(2) - 1)
        def _():
            out = acc_ref[...]
            if has_bias:
                out = out + b_ref[...].astype(jnp.float32)
            o_ref[...] = out.astype(o_ref.dtype)

    return kernel


def prepare_splinear(weight, bias=None):
    """One-time parameter prep (call at init / checkpoint load, NOT per
    forward): pick N/K tiles, transpose weight [N, K] -> [K_pad, N_pad] and
    pad weight/bias to tile multiples."""
    N, K = weight.shape
    tn = _pick_tile(N, _N_TILES, 128)
    tk = _pick_tile(K, _K_TILES, 128)
    n_pad, k_pad = _round_up(N, tn), _round_up(K, tk)

    w_t = jnp.asarray(weight).T                      # [K, N]
    if (k_pad, n_pad) != (K, N):
        w_t = jnp.pad(w_t, ((0, k_pad - K), (0, n_pad - N)))

    b = None
    if bias is not None:
        b = jnp.asarray(bias)
        if n_pad != N:
            b = jnp.pad(b, (0, n_pad - N))
        b = b.reshape(1, n_pad)
    return w_t, b, N, tn, tk


@partial(jax.jit, static_argnames=("n_out", "tn", "tk"))
def splinear_prepared(x, w_t, b, n_out, tn, tk):
    """Forward pass with an already prepared weight (from prepare_splinear)."""
    M, K = x.shape
    k_pad, n_pad = w_t.shape
    assert K <= k_pad and n_pad % tn == 0 and k_pad % tk == 0

    tm = _pick_tile(M, _M_TILES, _sublane_multiple(x.dtype))
    m_pad = _round_up(M, tm)

    x_p = x
    if (m_pad, k_pad) != (M, K):
        x_p = jnp.pad(x, ((0, m_pad - M), (0, k_pad - K)))

    out_dtype = x.dtype
    grid = (m_pad // tm, n_pad // tn, k_pad // tk)

    has_bias = b is not None
    direct_acc = jnp.dtype(out_dtype) == jnp.dtype(jnp.float32)
    kernel = _make_kernel(has_bias, direct_acc)

    in_specs = [
        pl.BlockSpec((tm, tk), lambda i, j, k: (i, k)),   # x tile
        pl.BlockSpec((tk, tn), lambda i, j, k: (k, j)),   # W^T tile [K, N]
    ]
    operands = [x_p, w_t]
    if has_bias:
        in_specs.append(pl.BlockSpec((1, tn), lambda i, j, k: (0, j)))
        operands.append(b)

    scratch = [] if direct_acc else [pltpu.VMEM((tm, tn), jnp.float32)]

    # bytes_accessed reflects actual traffic incl. re-reads: x is re-fetched
    # once per N block, the weight once per M block.
    x_bytes = jnp.dtype(x.dtype).itemsize
    w_bytes = jnp.dtype(w_t.dtype).itemsize
    o_bytes = jnp.dtype(out_dtype).itemsize
    bytes_accessed = (x_p.size * (n_pad // tn) * x_bytes
                      + w_t.size * (m_pad // tm) * w_bytes
                      + m_pad * n_pad * o_bytes)
    if has_bias:
        bytes_accessed += b.size * (m_pad // tm) * jnp.dtype(b.dtype).itemsize
    cost = pl.CostEstimate(flops=2 * m_pad * n_pad * k_pad,
                           transcendentals=0,
                           bytes_accessed=int(bytes_accessed))

    out = pl.pallas_call(
        kernel,
        out_shape=jax.ShapeDtypeStruct((m_pad, n_pad), out_dtype),
        grid_spec=pltpu.PrefetchScalarGridSpec(
            num_scalar_prefetch=0,
            grid=grid,
            in_specs=in_specs,
            out_specs=pl.BlockSpec((tm, tn), lambda i, j, k: (i, j)),
            scratch_shapes=scratch,
        ),
        compiler_params=pltpu.CompilerParams(
            dimension_semantics=("parallel", "parallel", "arbitrary"),
            vmem_limit_bytes=_vmem_limit_bytes()),
        cost_estimate=cost,
    )(*operands)

    if (m_pad, n_pad) != (M, n_out):
        out = out[:M, :n_out]
    return out


def splinear(x, weight, bias=None):
    """Pallas equivalent of SpLinearFunc.forward: x.mm(weight.t()) + bias.

    Convenience one-shot path: re-prepares (transposes/pads) the weight on
    every call.  For repeated forwards, call prepare_splinear(...) once and
    reuse splinear_prepared(...) to avoid the per-call weight copy.
    """
    M, K = x.shape
    N, K2 = weight.shape
    assert K == K2, f"in_features mismatch: {K} vs {K2}"
    w_t, b, n_out, tn, tk = prepare_splinear(weight, bias)
    return splinear_prepared(x, w_t, b, n_out, tn, tk)


def init_splinear_params(key, input_features, output_features, bias=True,
                         dtype=jnp.float32):
    """Mirror SpLinear.__init__: weight ~ U(-stdv, stdv), stdv = 1/sqrt(in).
    (PyTorch leaves bias uninitialized; we init it the same way so the demo
    is deterministic.)"""
    stdv = 1.0 / math.sqrt(input_features)
    kw, kb = jax.random.split(key)
    weight = jax.random.uniform(
        kw, (output_features, input_features), dtype=dtype,
        minval=-stdv, maxval=stdv)
    b = None
    if bias:
        b = jax.random.uniform(
            kb, (output_features,), dtype=dtype, minval=-stdv, maxval=stdv)
    return weight, b


# TODO(synk): backward pass (grad_input / grad_weight / grad_bias from
# SpLinearFunc.backward) is not implemented; only forward semantics here.


if __name__ == "__main__":
    key = jax.random.PRNGKey(0)
    k_x, k_p, k_x2, k_p2 = jax.random.split(key, 4)

    # --- Test 1: module-scale shapes (single tile after padding), with bias ---
    batch, in_feat, out_feat = 8, 32, 16
    x = jax.random.normal(k_x, (batch, in_feat), dtype=jnp.float32)
    weight, bias = init_splinear_params(k_p, in_feat, out_feat, bias=True)

    out = jax.block_until_ready(splinear(x, weight, bias))
    ref = jnp.dot(x, weight.T, precision=lax.Precision.HIGHEST) + bias[None, :]
    assert out.shape == (batch, out_feat)
    assert jnp.allclose(out, ref, atol=2e-3, rtol=2e-3), "mismatch (small)"

    # --- Test 2: prepared-weight path with ragged M/N/K (exercises K
    # accumulation over multiple K tiles, padding/unpadding, bias) ---
    M2, K2_, N2 = 200, 1500, 300
    x2 = jax.random.normal(k_x2, (M2, K2_), dtype=jnp.float32)
    w2, b2 = init_splinear_params(k_p2, K2_, N2, bias=True)

    w2_t, b2_p, n_out2, tn2, tk2 = prepare_splinear(w2, b2)   # once, at init
    out2 = jax.block_until_ready(
        splinear_prepared(x2, w2_t, b2_p, n_out2, tn2, tk2))
    ref2 = jnp.dot(x2, w2.T, precision=lax.Precision.HIGHEST) + b2[None, :]
    assert out2.shape == (M2, N2)
    assert jnp.allclose(out2, ref2, atol=5e-3, rtol=5e-3), "mismatch (tiled)"

    # --- Test 3: no-bias path ---
    out3 = jax.block_until_ready(splinear(x, weight, None))
    ref3 = jnp.dot(x, weight.T, precision=lax.Precision.HIGHEST)
    assert jnp.allclose(out3, ref3, atol=2e-3, rtol=2e-3), "mismatch (nobias)"

    print("KERNEL_OK")
</pallas_src>

<mosaic_0001>
module attributes {stable_mosaic.version = 11 : i64} {
  func.func @kernel(%arg0: i32, %arg1: i32, %arg2: i32, %arg3: memref<8x128xf32, #tpu.memory_space<vmem>>, %arg4: memref<128x128xf32, #tpu.memory_space<vmem>>, %arg5: memref<1x128xf32, #tpu.memory_space<vmem>>, %arg6: memref<8x128xf32, #tpu.memory_space<vmem>>) attributes {dimension_semantics = [#tpu.dimension_semantics<parallel>, #tpu.dimension_semantics<parallel>, #tpu.dimension_semantics<arbitrary>], iteration_bounds = array<i64: 1, 1, 1>, scalar_prefetch = 0 : i64, scratch_operands = 0 : i64, tpu.core_type = #tpu.core_type<tc>, window_params = [{transform_indices = @transform_0, window_bounds = array<i64: 8, 128>}, {transform_indices = @transform_1, window_bounds = array<i64: 128, 128>}, {transform_indices = @transform_2, window_bounds = array<i64: 1, 128>}, {transform_indices = @transform_3, window_bounds = array<i64: 8, 128>}]} {
    %c0_i32 = arith.constant 0 : i32
    %0 = arith.cmpi eq, %arg2, %c0_i32 : i32
    %1 = arith.extui %0 : i1 to i32
    %c0_i32_0 = arith.constant 0 : i32
    %2 = arith.cmpi ne, %1, %c0_i32_0 : i32
    scf.if %2 {
      %c0_8 = arith.constant 0 : index
      %c0_9 = arith.constant 0 : index
      %9 = vector.load %arg5[%c0_8, %c0_9] : memref<1x128xf32, #tpu.memory_space<vmem>>, vector<1x128xf32>
      %10 = vector.shape_cast %9 : vector<1x128xf32> to vector<1x128xf32>
      %11 = vector.broadcast %10 : vector<1x128xf32> to vector<8x128xf32>
      %c0_10 = arith.constant 0 : index
      %c0_11 = arith.constant 0 : index
      %12 = vector.load %arg6[%c0_10, %c0_11] : memref<8x128xf32, #tpu.memory_space<vmem>>, vector<8x128xf32>
      tpu.vector_store %arg6[%c0_10, %c0_11], %11 {strides = array<i32>} : memref<8x128xf32, #tpu.memory_space<vmem>>, vector<8x128xf32>,
    } else {
    }
    %c0 = arith.constant 0 : index
    %c0_1 = arith.constant 0 : index
    %3 = vector.load %arg6[%c0, %c0_1] : memref<8x128xf32, #tpu.memory_space<vmem>>, vector<8x128xf32>
    %c0_2 = arith.constant 0 : index
    %c0_3 = arith.constant 0 : index
    %4 = vector.load %arg3[%c0_2, %c0_3] : memref<8x128xf32, #tpu.memory_space<vmem>>, vector<8x128xf32>
    %c0_4 = arith.constant 0 : index
    %c0_5 = arith.constant 0 : index
    %5 = vector.load %arg4[%c0_4, %c0_5] : memref<128x128xf32, #tpu.memory_space<vmem>>, vector<128x128xf32>
    %cst = arith.constant dense<0.000000e+00> : vector<8x128xf32>
    %6 = tpu.matmul %4, %5, %cst {dimension_numbers = #tpu.dot_dimension_numbers<[1], [0], [0], [1], [0, 0, 1, 1], [], []>} : vector<8x128xf32>, vector<128x128xf32>, vector<8x128xf32> -> vector<8x128xf32>
    %7 = arith.addf %3, %6 : vector<8x128xf32>
    %c0_6 = arith.constant 0 : index
    %c0_7 = arith.constant 0 : index
    %8 = vector.load %arg6[%c0_6, %c0_7] : memref<8x128xf32, #tpu.memory_space<vmem>>, vector<8x128xf32>
    tpu.vector_store %arg6[%c0_6, %c0_7], %7 {strides = array<i32>} : memref<8x128xf32, #tpu.memory_space<vmem>>, vector<8x128xf32>,
    return
  }
  func.func @transform_0(%arg0: i32, %arg1: i32, %arg2: i32) -> (i32, i32) {
    %c0_i32 = arith.constant 0 : i32
    return %arg0, %arg2 : i32, i32
  }
  func.func @transform_1(%arg0: i32, %arg1: i32, %arg2: i32) -> (i32, i32) {
    %c0_i32 = arith.constant 0 : i32
    return %arg2, %arg1 : i32, i32
  }
  func.func @transform_2(%arg0: i32, %arg1: i32, %arg2: i32) -> (i32, i32) {
    %c0_i32 = arith.constant 0 : i32
    %c0_i32_0 = arith.constant 0 : i32
    return %c0_i32, %arg1 : i32, i32
  }
  func.func @transform_3(%arg0: i32, %arg1: i32, %arg2: i32) -> (i32, i32) {
    %c0_i32 = arith.constant 0 : i32
    return %arg0, %arg1 : i32, i32
  }
}

</mosaic_0001>

<bundles_post_ra>
// kernel: splinear_prepared.1
= control target key start
LH: loop header
LB: loop body
LE: loop exit
PB: predicated region body
PF: predicated region fallthrough
CT: control target
= control target key end

     0   :  { %8 = vsyncpa [#allocation3], 0  ;;  %s335_s0 = inlined_call_operand.vmem [shape: f32[8,128], index: 0, kind: input, shape index: {}]   ;;  %s336_s1 = inlined_call_operand.hbm [shape: f32[128,128], index: 1, kind: input, shape index: {}]   ;;  %s337_s2 = inlined_call_operand.vmem [shape: f32[1,128], index: 2, kind: input, shape index: {}]   ;;  %s338_s3 = inlined_call_operand.hbm [shape: f32[8,128], index: 3, kind: output, shape index: {}]  }
   0x1   :  { %9 = vsyncpa [#allocation4], 0  ;;  %s278_s12 = smov [#allocation2]   ;;  %s230_s16 = scalar_lea.hbm %s336_s1, 2048 }
   0x2   :  { %s17_s13 = sshll.u32 %s278_s12, 4  ;;  %p231_p0 = scmp.ne.s32.totalorder %s336_s1, %s230_s16  ;;  %s18_s13 = int_to_ptr.vmem [resolvable:$true] %s17_s13 }
   0x3   :  { %p234_p1 = scmp.lt.u32.totalorder %s230_s16, %s336_s1 }
   0x5   :  { %p236_p2 = pnand %p234_p1, %p231_p0 }
   0x7   :  { %239 = shalt.err (!%p236_p2)
}
   0x8   :  { %s240_s21 = scalar_lea.vmem %s18_s13, 2048  ;;  %p245_p4 = scmp.lt.s32.totalorder %s18_s13, %s18_s13 }
   0x9   :  { %p241_p3 = scmp.ne.s32.totalorder %s18_s13, %s240_s21  ;;  %p246_p5 = scmp.lt.s32.totalorder %s240_s21, %s240_s21 }
   0xb   :  { %p247_p6 = por %p246_p5, %p245_p4 }
   0xd   :  { %p248_p7 = pnand %p247_p6, %p241_p3 }
   0xf   :  { %251 = shalt.err (!%p248_p7)
}
  0x10   :  { %s279_s22 = smov 128   ;;  %s280_s23 = smov 8  }
  0x11   :  { %23 = dma.hbm_to_vmem [thread:$0]  %s336_s1, 2048, %s18_s13, [#allocation3], %s279_s22, %s279_s22, %s280_s23  }
  0x12   :  { %274 = dma.done.wait [#allocation3], 2048  }
  0x13   :  { %275 = vsyncadd [#allocation3], 4294965248  ;;  %v281_v0 = vmov 0.0|0.0   ;;  %vm282_vm0 = vmmov 0   ;;  %v283_v1 = vmov 0.0   ;;  %v43_v2 = vld [vmem:[#allocation2] sm:$0xff] }
  0x14   :  { %199 = vmatprep.subr.bf16.mxu0 %v281_v0  ;;  %196 = vmatprep.mubr.msk.f32.mxu0 %vm282_vm0, %v283_v1  ;;  %v44_v3 = vld [vmem:[#allocation2 + $0x8] sm:$0xff]  ;;  %v45_v4 = vld [vmem:[#allocation2 + $0x10] sm:$0xff]  ;;  %v46_v6 = vld [vmem:[#allocation2 + $0x18] sm:$0xff]  ;;  %s284_s29 = smov [#allocation5]  }
  0x15   :  { %v200_v5 = vpack.c.bf16 %v44_v3, %v43_v2  ;;  %v203_v7 = vpack.c.bf16 %v46_v6, %v45_v4  ;;  %v47_v8 = vld [vmem:[#allocation2 + $0x20] sm:$0xff]  ;;  %v48_v9 = vld [vmem:[#allocation2 + $0x28] sm:$0xff]  ;;  %v49_v11 = vld [vmem:[#allocation2 + $0x30] sm:$0xff]  ;;  %s137_s30 = sshll.u32 %s284_s29, 4  ;;  %s138_s30 = int_to_ptr.vmem [resolvable:$true] %s137_s30 }
  0x16   :  { %v206_v10 = vpack.c.bf16 %v48_v9, %v47_v8  ;;  %v50_v12 = vld [vmem:[#allocation2 + $0x38] sm:$0xff]  ;;  %v51_v14 = vld [vmem:[#allocation2 + $0x40] sm:$0xff]  ;;  %v52_v15 = vld [vmem:[#allocation2 + $0x48] sm:$0xff]  ;;  %s252_s4 = scalar_lea.vmem %s138_s30, 128  ;;  %p257_p9 = scmp.lt.s32.totalorder %s138_s30, %s138_s30 }
  0x17   :  { %201 = vmatpush3.bf16.msra.mxu0 %v200_v5  ;;  %v209_v13 = vpack.c.bf16 %v50_v12, %v49_v11  ;;  %v212_v16 = vpack.c.bf16 %v52_v15, %v51_v14  ;;  %v53_v17 = vld [vmem:[#allocation2 + $0x50] sm:$0xff]  ;;  %v54_v18 = vld [vmem:[#allocation2 + $0x58] sm:$0xff]  ;;  %v55_v20 = vld [vmem:[#allocation2 + $0x60] sm:$0xff]  ;;  %p253_p8 = scmp.ne.s32.totalorder %s138_s30, %s252_s4  ;;  %p258_p10 = scmp.lt.s32.totalorder %s252_s4, %s252_s4 }
  0x18   :  { %202 = vmatprep.subr.bf16.mxu0 %v281_v0  ;;  %v215_v19 = vpack.c.bf16 %v54_v18, %v53_v17  ;;  %v56_v21 = vld [vmem:[#allocation2 + $0x68] sm:$0xff]  ;;  %v57_v23 = vld [vmem:[#allocation2 + $0x70] sm:$0xff]  ;;  %v58_v24 = vld [vmem:[#allocation2 + $0x78] sm:$0xff] }
  0x19   :  { %v218_v22 = vpack.c.bf16 %v56_v21, %v55_v20  ;;  %v221_v25 = vpack.c.bf16 %v58_v24, %v57_v23  ;;  %v42_v26 = vld [vmem:[%s335_s0] sm:$0xff]  ;;  %p259_p11 = por %p258_p10, %p257_p9 }
  0x1a   :  { %v146_v27 = vld [vmem:[%s337_s2] ss:$0 sm:$0xff] }
  0x1b   :  { %204 = vmatpush3.bf16.msra.mxu0 %v203_v7  ;;  %p260_p12 = pnand %p259_p11, %p253_p8 }
  0x1c   :  { %205 = vmatprep.subr.bf16.mxu0 %v281_v0 }
  0x1f   :  { %207 = vmatpush3.bf16.msra.mxu0 %v206_v10 }
  0x20   :  { %208 = vmatprep.subr.bf16.mxu0 %v281_v0 }
  0x23   :  { %210 = vmatpush3.bf16.msra.mxu0 %v209_v13 }
  0x24   :  { %211 = vmatprep.subr.bf16.mxu0 %v281_v0 }
  0x27   :  { %213 = vmatpush3.bf16.msra.mxu0 %v212_v16 }
  0x28   :  { %214 = vmatprep.subr.bf16.mxu0 %v281_v0 }
  0x2b   :  { %216 = vmatpush3.bf16.msra.mxu0 %v215_v19 }
  0x2c   :  { %217 = vmatprep.subr.bf16.mxu0 %v281_v0 }
  0x2f   :  { %219 = vmatpush3.bf16.msra.mxu0 %v218_v22 }
  0x30   :  { %220 = vmatprep.subr.bf16.mxu0 %v281_v0 }
  0x33   :  { %222 = vmatpush3.bf16.msra.mxu0 %v221_v25 }
  0x36   :  { %197 = vmatmul.mubr.f32.vlgmr.msra.gmra.mrb[0].mxu0 %v42_v26 }
 0x109   :  { %v125_v28 = vpop.f32.mrb[0].mxu0 }
 0x10a   :  { %v129_v29 = vadd.f32 %v146_v27, %v125_v28  ;;  %v198_v30 = vpop.f32.mrb[1].mxu0 }
 0x10c   :  { %130 = vst [vmem:[#allocation5] sm:$0xff] %v129_v29 }
 0x10d   :  { %263 = shalt.err (!%p260_p12)
}
 0x10e   :  { %s264_s6 = scalar_lea.hbm %s338_s3, 128 }
 0x10f   :  { %p265_p13 = scmp.ne.s32.totalorder %s338_s3, %s264_s6  ;;  %p268_p0 = scmp.lt.u32.totalorder %s264_s6, %s338_s3 }
 0x111   :  { %p270_p1 = pnand %p268_p0, %p265_p13 }
 0x113   :  { %273 = shalt.err (!%p270_p1)
}
 0x114   :  { %140 = dma.vmem_to_hbm [thread:$0]  %s138_s30, 128, %s338_s3, [#allocation4]  }
 0x115   :  { %276 = dma.done.wait [#allocation4], 128  }
 0x116   :  { %277 = vsyncadd [#allocation4], 4294967168 }
 0x117   :  { %144 = vsyncpa [#allocation3], 1 }
 0x118   :  { %145 = vsyncpa [#allocation4], 1 }

</bundles_post_ra>
